<compile_context>
chip_gen: v6e
topology: v6e:2x2x1
jax: 0.10.0
libtpu: 0.0.40
codegen_flags: <defaults>
</compile_context>

<pallas_src>
import functools

import jax
import jax.numpy as jnp
from jax.experimental import pallas as pl
from jax.experimental.pallas import tpu as pltpu


_LANE = 128


def _round_up(a: int, b: int) -> int:
    return (a + b - 1) // b * b


def _vmem_capacity_bytes() -> int:
    """Physical VMEM capacity of the attached TPU (safe fallback = 64 MiB, v7x per-TC)."""
    try:
        info = pltpu.get_tpu_info()
        for attr in ("vmem_capacity_bytes", "vmem_bytes", "vmem_size_bytes"):
            v = getattr(info, attr, None)
            if v:
                return int(v)
    except Exception:
        pass
    return 64 * 1024 * 1024


@functools.lru_cache(maxsize=None)
def _single_buffer_weights_supported() -> bool:
    """One-time capability probe for pl.Buffered(1) (single-buffered resident weights).

    The probe is a tiny standalone pallas_call, so the real kernel is never wrapped in a
    try/except and genuine VMEM-OOM errors are not masked.
    """
    if not hasattr(pl, "Buffered"):
        return False
    try:
        def _probe(x_ref, o_ref):
            o_ref[...] = x_ref[...]
        out = pl.pallas_call(
            _probe,
            out_shape=jax.ShapeDtypeStruct((8, _LANE), jnp.float32),
            grid=(1,),
            in_specs=[pl.BlockSpec((8, _LANE), lambda i: (0, 0),
                                   pipeline_mode=pl.Buffered(1))],
            out_specs=pl.BlockSpec((8, _LANE), lambda i: (0, 0)),
        )(jnp.zeros((8, _LANE), jnp.float32))
        jax.block_until_ready(out)
        return True
    except Exception:
        return False


# --------------------------------------------------------------------------------------
# Kernels
# --------------------------------------------------------------------------------------

def _ffn_resident_kernel(x_ref, w1_ref, b1_ref, w2_ref, b2_ref, o_ref, *, compute_dtype):
    """Fused FFN tile with VMEM-resident weights: relu(x @ W1 + b1) @ W2 + b2 + x."""
    x = x_ref[...]
    xc = x.astype(compute_dtype)
    h = jnp.dot(xc, w1_ref[...], preferred_element_type=jnp.float32)
    h = jnp.maximum(h + b1_ref[...], 0.0)
    y = jnp.dot(h.astype(compute_dtype), w2_ref[...], preferred_element_type=jnp.float32)
    y = y + b2_ref[...]
    # dropout: identity in eval mode; residual add in f32.
    o_ref[...] = (y + x.astype(jnp.float32)).astype(o_ref.dtype)


def _ffn_kstream_kernel(x_ref, w1_ref, b1_ref, w2_ref, b2_ref, o_ref, acc_ref, *,
                        compute_dtype):
    """K-blocked FFN: stream hidden-dim blocks of W1/W2, accumulate y in f32 scratch.

    Valid because ReLU acts per hidden unit: sum_k relu(x @ W1[:,k] + b1[k]) @ W2[k,:].
    """
    k = pl.program_id(1)

    @pl.when(k == 0)
    def _():
        acc_ref[...] = jnp.zeros_like(acc_ref)

    x = x_ref[...]
    xc = x.astype(compute_dtype)
    h = jnp.dot(xc, w1_ref[...], preferred_element_type=jnp.float32)
    h = jnp.maximum(h + b1_ref[...], 0.0)
    acc_ref[...] += jnp.dot(h.astype(compute_dtype), w2_ref[...],
                            preferred_element_type=jnp.float32)

    @pl.when(k == pl.num_programs(1) - 1)
    def _():
        o_ref[...] = (acc_ref[...] + b2_ref[...] + x.astype(jnp.float32)).astype(o_ref.dtype)


# --------------------------------------------------------------------------------------
# Parameter prep + VMEM accounting
# --------------------------------------------------------------------------------------

def prepare_ffn_params(w1, b1, w2, b2, matmul_dtype=None):
    """One-time parameter prep: pad to lane/MXU-aligned shapes, transpose to (in,out).

    w1: (hidden, input), b1: (hidden,), w2: (input, hidden), b2: (input,)  (nn.Linear).
    matmul_dtype=jnp.bfloat16 enables the bf16 MXU path (f32 accumulation) — recommended
    on ALL generations, including v5e (bf16-native MXU, f32 matmul is emulated there).
    """
    H, D = w1.shape
    assert w2.shape == (D, H), "w2 must be (input_dim, hidden_dim)"
    Dp = _round_up(D, _LANE)
    Hp = _round_up(H, _LANE)
    w_dtype = jnp.dtype(matmul_dtype) if matmul_dtype is not None else jnp.dtype(w1.dtype)

    w1t = jnp.pad(w1, ((0, Hp - H), (0, Dp - D))).T.astype(w_dtype)   # (Dp, Hp)
    w2t = jnp.pad(w2, ((0, Dp - D), (0, Hp - H))).T.astype(w_dtype)   # (Hp, Dp)
    b1p = jnp.pad(b1, (0, Hp - H)).astype(jnp.float32).reshape(1, Hp)
    b2p = jnp.pad(b2, (0, Dp - D)).astype(jnp.float32).reshape(1, Dp)

    return {"w1t": w1t, "b1": b1p, "w2t": w2t, "b2": b2p,
            "D": D, "H": H, "Dp": Dp, "Hp": Hp, "compute_dtype": w_dtype}


def _resident_need(tile, Dp, Hp, x_it, w_it, wbuf):
    """VMEM bytes for the weight-resident path (wbuf=1 if Buffered(1), else 2)."""
    weights = wbuf * (2 * Dp * Hp * w_it + (Hp + Dp) * 4)
    io = 4 * tile * Dp * x_it                                  # x + out tiles, double-buffered
    interm = tile * Hp * (4 + w_it) + 2 * tile * Dp * 4        # h (f32 + cast) + y/residual f32
    return weights + io + interm


def _stream_need(tile, tk, Dp, x_it, w_it):
    """VMEM bytes for the K-blocked path (weight blocks double-buffered)."""
    wblocks = 2 * (2 * Dp * tk * w_it + tk * 4)                # W1 col-blk + W2 row-blk + b1 blk
    b2 = 2 * Dp * 4
    io = 4 * tile * Dp * x_it
    acc = tile * Dp * 4
    interm = tile * tk * (4 + w_it) + tile * Dp * 4
    return wblocks + b2 + io + acc + interm


# --------------------------------------------------------------------------------------
# Wrapper
# --------------------------------------------------------------------------------------

def feed_forward_apply(x, params, *, tile_n=None, tile_h=None, force_k_stream=False):
    """Apply the fused FFN kernel to x of shape (..., input_dim)."""
    orig_shape = x.shape
    D = orig_shape[-1]
    assert D == params["D"], "last dim of x must equal input_dim"
    Dp, Hp = params["Dp"], params["Hp"]
    compute_dtype = params["compute_dtype"]

    x2d = x.reshape(-1, D)
    N = x2d.shape[0]
    x_it = jnp.dtype(x.dtype).itemsize
    w_it = jnp.dtype(compute_dtype).itemsize

    # Sublane quantum for the activation tile (f32 -> 8, bf16 -> 16, int8/fp8 -> 32).
    row_q = {4: 8, 2: 16, 1: 32}.get(x_it, 8)
    n_cap = _round_up(N, row_q)

    cap = _vmem_capacity_bytes()
    budget = int(0.70 * cap)           # ~90 MiB on v5e/v6e (128 MiB), ~45 MiB on v7x (64 MiB/TC)

    single_buf = _single_buffer_weights_supported()
    wbuf = 1 if single_buf else 2
    resident_w_bytes = wbuf * (2 * Dp * Hp * w_it + (Hp + Dp) * 4)

    tile_cands = [c for c in (8, 16, 32, 64, 128, 256, 512) if c % row_q == 0]

    use_stream = (bool(force_k_stream)
                  or resident_w_bytes > int(0.65 * budget)
                  or _resident_need(tile_cands[0], Dp, Hp, x_it, w_it, wbuf) > budget)

    tile_h_pick = None
    if not use_stream:
        if tile_n is None:
            pick = tile_cands[0]
            for c in tile_cands:                       # largest tile that fits (prefers 512)
                if _resident_need(c, Dp, Hp, x_it, w_it, wbuf) <= budget:
                    pick = c
            tile_n = pick
        tile_n = max(row_q, _round_up(int(tile_n), row_q))
        tile_n = min(tile_n, n_cap)
        vmem_need = _resident_need(tile_n, Dp, Hp, x_it, w_it, wbuf)
    else:
        tk_cands = [c for c in (1024, 512, 256, 128) if c <= Hp and Hp % c == 0]
        if tile_h is not None:
            th = max(_LANE, _round_up(int(tile_h), _LANE))
            while Hp % th:
                th -= _LANE
            tk_cands = [th]
        tk_min = min(tk_cands)
        if tile_n is None:
            pick = tile_cands[0]
            for c in tile_cands:
                if _stream_need(c, tk_min, Dp, x_it, w_it) <= budget:
                    pick = c
            tile_n = pick
        tile_n = max(row_q, _round_up(int(tile_n), row_q))
        tile_n = min(tile_n, n_cap)
        tile_h_pick = tk_min
        for tk in sorted(tk_cands):                    # largest hidden block that still fits
            if _stream_need(tile_n, tk, Dp, x_it, w_it) <= budget:
                tile_h_pick = tk
        vmem_need = _stream_need(tile_n, tile_h_pick, Dp, x_it, w_it)

    n_pad = _round_up(N, tile_n)

    # Fast path: skip the HBM-copying pad / slice entirely when shapes are already aligned.
    needs_pad = (Dp != D) or (n_pad != N)
    x_in = x2d if not needs_pad else jnp.pad(x2d, ((0, n_pad - N), (0, Dp - D)))

    # vmem_limit_bytes: generation-aware, never below the actual need (+ margin).
    vmem_limit = max(int(vmem_need) + (4 << 20), 32 << 20)
    vmem_limit = min(vmem_limit, max(int(0.92 * cap), int(vmem_need) + (2 << 20)))

    out_shape = jax.ShapeDtypeStruct((n_pad, Dp), x.dtype)
    n_row_tiles = n_pad // tile_n
    w1t, b1p, w2t, b2p = params["w1t"], params["b1"], params["w2t"], params["b2"]
    flops = 4 * n_pad * Dp * Hp

    if not use_stream:
        bytes_accessed = 2 * n_pad * Dp * x_it + 2 * Dp * Hp * w_it + (Hp + Dp) * 4
        cost = pl.CostEstimate(flops=flops, transcendentals=0,
                               bytes_accessed=int(bytes_accessed))
        # Weights/biases are grid-invariant -> DMA'd once; single-buffer them when supported.
        wb_kwargs = {"pipeline_mode": pl.Buffered(1)} if single_buf else {}
        grid_spec = pltpu.PrefetchScalarGridSpec(
            num_scalar_prefetch=0,
            grid=(n_row_tiles,),
            in_specs=[
                pl.BlockSpec((tile_n, Dp), lambda i: (i, 0)),               # x tile
                pl.BlockSpec((Dp, Hp), lambda i: (0, 0), **wb_kwargs),      # W1^T (resident)
                pl.BlockSpec((1, Hp), lambda i: (0, 0), **wb_kwargs),       # b1
                pl.BlockSpec((Hp, Dp), lambda i: (0, 0), **wb_kwargs),      # W2^T (resident)
                pl.BlockSpec((1, Dp), lambda i: (0, 0), **wb_kwargs),       # b2
            ],
            out_specs=pl.BlockSpec((tile_n, Dp), lambda i: (i, 0)),
        )
        out_p = pl.pallas_call(
            functools.partial(_ffn_resident_kernel, compute_dtype=compute_dtype),
            out_shape=out_shape,
            grid_spec=grid_spec,
            compiler_params=pltpu.CompilerParams(
                dimension_semantics=("parallel",),       # rows independent; megacore on v7x
                vmem_limit_bytes=int(vmem_limit)),
            cost_estimate=cost,
        )(x_in, w1t, b1p, w2t, b2p)
    else:
        k_tiles = Hp // tile_h_pick
        bytes_accessed = (2 * n_pad * Dp * x_it
                          + n_row_tiles * (2 * Dp * Hp * w_it + Hp * 4)
                          + Dp * 4)
        cost = pl.CostEstimate(flops=flops, transcendentals=0,
                               bytes_accessed=int(bytes_accessed))
        grid_spec = pltpu.PrefetchScalarGridSpec(
            num_scalar_prefetch=0,
            grid=(n_row_tiles, k_tiles),
            in_specs=[
                pl.BlockSpec((tile_n, Dp), lambda i, k: (i, 0)),            # x tile (resident over k)
                pl.BlockSpec((Dp, tile_h_pick), lambda i, k: (0, k)),       # W1^T column block
                pl.BlockSpec((1, tile_h_pick), lambda i, k: (0, k)),        # b1 block
                pl.BlockSpec((tile_h_pick, Dp), lambda i, k: (k, 0)),       # W2^T row block
                pl.BlockSpec((1, Dp), lambda i, k: (0, 0)),                 # b2
            ],
            out_specs=pl.BlockSpec((tile_n, Dp), lambda i, k: (i, 0)),
            scratch_shapes=[pltpu.VMEM((tile_n, Dp), jnp.float32)],         # f32 accumulator
        )
        out_p = pl.pallas_call(
            functools.partial(_ffn_kstream_kernel, compute_dtype=compute_dtype),
            out_shape=out_shape,
            grid_spec=grid_spec,
            compiler_params=pltpu.CompilerParams(
                dimension_semantics=("parallel", "arbitrary"),
                vmem_limit_bytes=int(vmem_limit)),
            cost_estimate=cost,
        )(x_in, w1t, b1p, w2t, b2p)

    out = out_p if not needs_pad else out_p[:N, :D]
    return out.reshape(orig_shape)


def feed_forward_layer(x, w1, b1, w2, b2, *, tile_n=None, tile_h=None, matmul_dtype=None):
    """Convenience wrapper: prepare params (pad + transpose once) and apply.
    matmul_dtype=jnp.bfloat16 is the recommended fast path on v5e, v6e and v7x."""
    params = prepare_ffn_params(w1, b1, w2, b2, matmul_dtype=matmul_dtype)
    return feed_forward_apply(x, params, tile_n=tile_n, tile_h=tile_h)


def _reference(x, w1, b1, w2, b2):
    h = jnp.maximum(x @ w1.T + b1, 0.0)
    return h @ w2.T + b2 + x


if __name__ == "__main__":
    key = jax.random.PRNGKey(0)
    (k_x, k_w1, k_b1, k_w2, k_b2,
     k_x2, k_x3, k_w3, k_b3, k_w4, k_b4) = jax.random.split(key, 11)

    batch, seq, input_dim, hidden_dim = 2, 8, 32, 64
    x = jax.random.normal(k_x, (batch, seq, input_dim), dtype=jnp.float32)

    # Deterministic parameter init (PyTorch nn.Linear shape conventions).
    bound1 = 1.0 / (input_dim ** 0.5)
    w1 = jax.random.uniform(k_w1, (hidden_dim, input_dim), jnp.float32, -bound1, bound1)
    b1 = jax.random.uniform(k_b1, (hidden_dim,), jnp.float32, -bound1, bound1)
    bound2 = 1.0 / (hidden_dim ** 0.5)
    w2 = jax.random.uniform(k_w2, (input_dim, hidden_dim), jnp.float32, -bound2, bound2)
    b2 = jax.random.uniform(k_b2, (input_dim,), jnp.float32, -bound2, bound2)

    ref = _reference(x, w1, b1, w2, b2)

    # 1) f32 weight-resident path (exact check), prepared-params API, auto tile.
    params_f32 = prepare_ffn_params(w1, b1, w2, b2)
    out = jax.block_until_ready(feed_forward_apply(x, params_f32))
    assert out.shape == x.shape
    assert jnp.allclose(out, ref, atol=1e-5, rtol=1e-5), "f32 resident mismatch vs reference"

    # 2) Multi-tile + ragged-row path: N=18 rows, tile_n=8 -> grid of 3 with row padding.
    x2 = jax.random.normal(k_x2, (2, 9, input_dim), dtype=jnp.float32)
    out2 = jax.block_until_ready(feed_forward_apply(x2, params_f32, tile_n=8))
    assert jnp.allclose(out2, _reference(x2, w1, b1, w2, b2), atol=1e-5, rtol=1e-5), \
        "tiled/padded mismatch vs reference"

    # 3) bf16 MXU path (f32 accumulate) — recommended on v5e as well as v6e/v7x.
    out_bf16 = jax.block_until_ready(
        feed_forward_layer(x, w1, b1, w2, b2, matmul_dtype=jnp.bfloat16))
    assert float(jnp.max(jnp.abs(out_bf16 - ref))) < 1e-1, "bf16 path diverged"

    # 4) K-streamed (weight-blocked) path on a 128-aligned input: exercises the no-pad fast
    #    path and the f32 accumulator with pl.when init/finalize over the hidden-dim grid axis.
    d2, h2 = 128, 256
    x3 = jax.random.normal(k_x3, (2, 8, d2), dtype=jnp.float32)
    b3_1 = 1.0 / (d2 ** 0.5)
    w3 = jax.random.uniform(k_w3, (h2, d2), jnp.float32, -b3_1, b3_1)
    b3 = jax.random.uniform(k_b3, (h2,), jnp.float32, -b3_1, b3_1)
    b4_1 = 1.0 / (h2 ** 0.5)
    w4 = jax.random.uniform(k_w4, (d2, h2), jnp.float32, -b4_1, b4_1)
    b4 = jax.random.uniform(k_b4, (d2,), jnp.float32, -b4_1, b4_1)
    params2 = prepare_ffn_params(w3, b3, w4, b4)
    out3 = jax.block_until_ready(
        feed_forward_apply(x3, params2, force_k_stream=True, tile_h=128))
    assert jnp.allclose(out3, _reference(x3, w3, b3, w4, b4), atol=1e-4, rtol=1e-4), \
        "k-streamed mismatch vs reference"

    print("KERNEL_OK")
</pallas_src>

<mosaic_0001>
module attributes {stable_mosaic.version = 11 : i64} {
  func.func @_probe(%arg0: i32, %arg1: memref<8x128xf32, #tpu.memory_space<vmem>>, %arg2: memref<8x128xf32, #tpu.memory_space<vmem>>) attributes {dimension_semantics = [#tpu.dimension_semantics<arbitrary>], iteration_bounds = array<i64: 1>, scalar_prefetch = 0 : i64, scratch_operands = 0 : i64, tpu.core_type = #tpu.core_type<tc>, window_params = [{pipeline_mode = #tpu.pipeline_mode<synchronous>, transform_indices = @transform_0, window_bounds = array<i64: 8, 128>}, {pipeline_mode = #tpu.pipeline_mode<synchronous>, transform_indices = @transform_1, window_bounds = array<i64: 8, 128>}]} {
    %c0 = arith.constant 0 : index
    %c0_0 = arith.constant 0 : index
    %0 = vector.load %arg1[%c0, %c0_0] : memref<8x128xf32, #tpu.memory_space<vmem>>, vector<8x128xf32>
    %c0_1 = arith.constant 0 : index
    %c0_2 = arith.constant 0 : index
    %1 = vector.load %arg2[%c0_1, %c0_2] : memref<8x128xf32, #tpu.memory_space<vmem>>, vector<8x128xf32>
    tpu.vector_store %arg2[%c0_1, %c0_2], %0 {strides = array<i32>} : memref<8x128xf32, #tpu.memory_space<vmem>>, vector<8x128xf32>,
    return
  }
  func.func @transform_0(%arg0: i32) -> (i32, i32) {
    %c0_i32 = arith.constant 0 : i32
    %c0_i32_0 = arith.constant 0 : i32
    %c0_i32_1 = arith.constant 0 : i32
    return %c0_i32, %c0_i32_0 : i32, i32
  }
  func.func @transform_1(%arg0: i32) -> (i32, i32) {
    %c0_i32 = arith.constant 0 : i32
    %c0_i32_0 = arith.constant 0 : i32
    %c0_i32_1 = arith.constant 0 : i32
    return %c0_i32, %c0_i32_0 : i32, i32
  }
}

module attributes {stable_mosaic.version = 11 : i64} {
  func.func @_ffn_resident_kernel(%arg0: i32, %arg1: memref<16x128xf32, #tpu.memory_space<vmem>>, %arg2: memref<128x128xf32, #tpu.memory_space<vmem>>, %arg3: memref<1x128xf32, #tpu.memory_space<vmem>>, %arg4: memref<128x128xf32, #tpu.memory_space<vmem>>, %arg5: memref<1x128xf32, #tpu.memory_space<vmem>>, %arg6: memref<16x128xf32, #tpu.memory_space<vmem>>) attributes {dimension_semantics = [#tpu.dimension_semantics<parallel>], iteration_bounds = array<i64: 1>, scalar_prefetch = 0 : i64, scratch_operands = 0 : i64, tpu.core_type = #tpu.core_type<tc>, window_params = [{transform_indices = @transform_0, window_bounds = array<i64: 16, 128>}, {pipeline_mode = #tpu.pipeline_mode<synchronous>, transform_indices = @transform_1, window_bounds = array<i64: 128, 128>}, {pipeline_mode = #tpu.pipeline_mode<synchronous>, transform_indices = @transform_2, window_bounds = array<i64: 1, 128>}, {pipeline_mode = #tpu.pipeline_mode<synchronous>, transform_indices = @transform_3, window_bounds = array<i64: 128, 128>}, {pipeline_mode = #tpu.pipeline_mode<synchronous>, transform_indices = @transform_4, window_bounds = array<i64: 1, 128>}, {transform_indices = @transform_5, window_bounds = array<i64: 16, 128>}]} {
    %c0 = arith.constant 0 : index
    %c0_0 = arith.constant 0 : index
    %0 = vector.load %arg1[%c0, %c0_0] : memref<16x128xf32, #tpu.memory_space<vmem>>, vector<16x128xf32>
    %c0_1 = arith.constant 0 : index
    %c0_2 = arith.constant 0 : index
    %1 = vector.load %arg2[%c0_1, %c0_2] : memref<128x128xf32, #tpu.memory_space<vmem>>, vector<128x128xf32>
    %cst = arith.constant dense<0.000000e+00> : vector<16x128xf32>
    %2 = tpu.matmul %0, %1, %cst {dimension_numbers = #tpu.dot_dimension_numbers<[1], [0], [0], [1], [0, 0, 1, 1], [], []>} : vector<16x128xf32>, vector<128x128xf32>, vector<16x128xf32> -> vector<16x128xf32>
    %c0_3 = arith.constant 0 : index
    %c0_4 = arith.constant 0 : index
    %3 = vector.load %arg3[%c0_3, %c0_4] : memref<1x128xf32, #tpu.memory_space<vmem>>, vector<1x128xf32>
    %4 = vector.broadcast %3 : vector<1x128xf32> to vector<16x128xf32>
    %5 = arith.addf %2, %4 : vector<16x128xf32>
    %cst_5 = arith.constant 0.000000e+00 : f32
    %6 = vector.broadcast %cst_5 : f32 to vector<16x128xf32>
    %7 = arith.maximumf %5, %6 : vector<16x128xf32>
    %c0_6 = arith.constant 0 : index
    %c0_7 = arith.constant 0 : index
    %8 = vector.load %arg4[%c0_6, %c0_7] : memref<128x128xf32, #tpu.memory_space<vmem>>, vector<128x128xf32>
    %cst_8 = arith.constant dense<0.000000e+00> : vector<16x128xf32>
    %9 = tpu.matmul %7, %8, %cst_8 {dimension_numbers = #tpu.dot_dimension_numbers<[1], [0], [0], [1], [0, 0, 1, 1], [], []>} : vector<16x128xf32>, vector<128x128xf32>, vector<16x128xf32> -> vector<16x128xf32>
    %c0_9 = arith.constant 0 : index
    %c0_10 = arith.constant 0 : index
    %10 = vector.load %arg5[%c0_9, %c0_10] : memref<1x128xf32, #tpu.memory_space<vmem>>, vector<1x128xf32>
    %11 = vector.broadcast %10 : vector<1x128xf32> to vector<16x128xf32>
    %12 = arith.addf %9, %11 : vector<16x128xf32>
    %13 = arith.addf %12, %0 : vector<16x128xf32>
    %c0_11 = arith.constant 0 : index
    %c0_12 = arith.constant 0 : index
    %14 = vector.load %arg6[%c0_11, %c0_12] : memref<16x128xf32, #tpu.memory_space<vmem>>, vector<16x128xf32>
    tpu.vector_store %arg6[%c0_11, %c0_12], %13 {strides = array<i32>} : memref<16x128xf32, #tpu.memory_space<vmem>>, vector<16x128xf32>,
    return
  }
  func.func @transform_0(%arg0: i32) -> (i32, i32) {
    %c0_i32 = arith.constant 0 : i32
    %c0_i32_0 = arith.constant 0 : i32
    return %arg0, %c0_i32 : i32, i32
  }
  func.func @transform_1(%arg0: i32) -> (i32, i32) {
    %c0_i32 = arith.constant 0 : i32
    %c0_i32_0 = arith.constant 0 : i32
    %c0_i32_1 = arith.constant 0 : i32
    return %c0_i32, %c0_i32_0 : i32, i32
  }
  func.func @transform_2(%arg0: i32) -> (i32, i32) {
    %c0_i32 = arith.constant 0 : i32
    %c0_i32_0 = arith.constant 0 : i32
    %c0_i32_1 = arith.constant 0 : i32
    return %c0_i32, %c0_i32_0 : i32, i32
  }
  func.func @transform_3(%arg0: i32) -> (i32, i32) {
    %c0_i32 = arith.constant 0 : i32
    %c0_i32_0 = arith.constant 0 : i32
    %c0_i32_1 = arith.constant 0 : i32
    return %c0_i32, %c0_i32_0 : i32, i32
  }
  func.func @transform_4(%arg0: i32) -> (i32, i32) {
    %c0_i32 = arith.constant 0 : i32
    %c0_i32_0 = arith.constant 0 : i32
    %c0_i32_1 = arith.constant 0 : i32
    return %c0_i32, %c0_i32_0 : i32, i32
  }
  func.func @transform_5(%arg0: i32) -> (i32, i32) {
    %c0_i32 = arith.constant 0 : i32
    %c0_i32_0 = arith.constant 0 : i32
    return %arg0, %c0_i32 : i32, i32
  }
}

</mosaic_0001>

<bundles_post_ra>
// kernel: tpu_custom_call.1
= control target key start
LH: loop header
LB: loop body
LE: loop exit
PB: predicated region body
PF: predicated region fallthrough
CT: control target
= control target key end

     0   :  { %6 = vsyncpa [#allocation3], 0  ;;  %s102_s0 = inlined_call_operand.hbm [shape: f32[8,128], index: 0, kind: input, shape index: {}]   ;;  %s103_s1 = inlined_call_operand.hbm [shape: f32[8,128], index: 1, kind: output, shape index: {}]  }
   0x1   :  { %7 = vsyncpa [#allocation4], 0  ;;  %s84_s6 = smov [#allocation2]  }
   0x2   :  { %s14_s7 = sshll.u32 %s84_s6, 4  ;;  %s15_s7 = int_to_ptr.vmem [resolvable:$true] %s14_s7 }
   0x3   :  { %s48_s8 = scalar_lea.vmem %s15_s7, 128  ;;  %p53_p1 = scmp.lt.s32.totalorder %s15_s7, %s15_s7 }
   0x4   :  { %p49_p0 = scmp.ne.s32.totalorder %s15_s7, %s48_s8  ;;  %p54_p2 = scmp.lt.s32.totalorder %s48_s8, %s48_s8 }
   0x6   :  { %p55_p3 = por %p54_p2, %p53_p1 }
   0x8   :  { %p56_p4 = pnand %p55_p3, %p49_p0 }
   0xa   :  { %59 = shalt.err (!%p56_p4)
}
   0xb   :  { %17 = dma.hbm_to_vmem [thread:$0]  %s102_s0, 128, %s15_s7, [#allocation3]  }
   0xc   :  { %80 = dma.done.wait [#allocation3], 128  }
   0xd   :  { %81 = vsyncadd [#allocation3], 4294967168  ;;  %s85_s11 = smov [#allocation5]   ;;  %v21_v0 = vld [vmem:[#allocation2] sm:$0xff] }
   0xe   :  { %s29_s12 = sshll.u32 %s85_s11, 4  ;;  %22 = vst [vmem:[#allocation5] sm:$0xff] %v21_v0  ;;  %s30_s12 = int_to_ptr.vmem [resolvable:$true] %s29_s12 }
   0xf   :  { %s60_s13 = scalar_lea.vmem %s30_s12, 128  ;;  %p65_p6 = scmp.lt.s32.totalorder %s30_s12, %s30_s12 }
  0x10   :  { %p61_p5 = scmp.ne.s32.totalorder %s30_s12, %s60_s13  ;;  %p66_p7 = scmp.lt.s32.totalorder %s60_s13, %s60_s13 }
  0x12   :  { %p67_p8 = por %p66_p7, %p65_p6 }
  0x14   :  { %p68_p9 = pnand %p67_p8, %p61_p5 }
  0x16   :  { %71 = shalt.err (!%p68_p9)
}
  0x17   :  { %32 = dma.vmem_to_hbm [thread:$0]  %s30_s12, 128, %s103_s1, [#allocation4]  }
  0x18   :  { %82 = dma.done.wait [#allocation4], 128  }
  0x19   :  { %83 = vsyncadd [#allocation4], 4294967168 }
  0x1a   :  { %36 = vsyncpa [#allocation3], 1 }
  0x1b   :  { %37 = vsyncpa [#allocation4], 1 }

// kernel: tpu_custom_call.1
= control target key start
LH: loop header
LB: loop body
LE: loop exit
PB: predicated region body
PF: predicated region fallthrough
CT: control target
= control target key end

     0   :  { %10 = vsyncpa [#allocation3], 0  ;;  %s554_s0 = inlined_call_operand.hbm [shape: f32[16,128], index: 0, kind: input, shape index: {}]   ;;  %s555_s1 = inlined_call_operand.hbm [shape: f32[128,128], index: 1, kind: input, shape index: {}]   ;;  %s556_s2 = inlined_call_operand.vmem [shape: f32[1,128], index: 2, kind: input, shape index: {}]   ;;  %s557_s3 = inlined_call_operand.hbm [shape: f32[128,128], index: 3, kind: input, shape index: {}]   ;;  %s558_s4 = inlined_call_operand.vmem [shape: f32[1,128], index: 4, kind: input, shape index: {}]   ;;  %s559_s5 = inlined_call_operand.hbm [shape: f32[16,128], index: 5, kind: output, shape index: {}]  }
   0x1   :  { %11 = vsyncpa [#allocation6], 0 }
   0x2   :  { %12 = vsyncpa [#allocation4], 0  ;;  %s484_s18 = smov [#allocation5]   ;;  %s485_s20 = smov [#allocation2]  }
   0x3   :  { %s30_s19 = sshll.u32 %s484_s18, 4  ;;  %s18_s21 = sshll.u32 %s485_s20, 4  ;;  %s31_s19 = int_to_ptr.vmem [resolvable:$true] %s30_s19  ;;  %s19_s21 = int_to_ptr.vmem [resolvable:$true] %s18_s21 }
   0x4   :  { %s406_s22 = scalar_lea.vmem %s31_s19, 2048  ;;  %p411_p1 = scmp.lt.s32.totalorder %s31_s19, %s31_s19 }
   0x5   :  { %p407_p0 = scmp.ne.s32.totalorder %s31_s19, %s406_s22  ;;  %p412_p2 = scmp.lt.s32.totalorder %s406_s22, %s406_s22 }
   0x7   :  { %p413_p3 = por %p412_p2, %p411_p1 }
   0x9   :  { %p414_p4 = pnand %p413_p3, %p407_p0 }
   0xb   :  { %417 = shalt.err (!%p414_p4)
}
   0xc   :  { %s486_s23 = smov 128   ;;  %s487_s24 = smov 8  }
   0xd   :  { %36 = dma.hbm_to_vmem [thread:$0]  %s555_s1, 2048, %s31_s19, [#allocation6], %s486_s23, %s486_s23, %s487_s24  }
   0xe   :  { %s426_s27 = scalar_lea.vmem %s19_s21, 256  ;;  %p431_p6 = scmp.lt.s32.totalorder %s19_s21, %s19_s21 }
   0xf   :  { %p427_p5 = scmp.ne.s32.totalorder %s19_s21, %s426_s27  ;;  %p432_p7 = scmp.lt.s32.totalorder %s426_s27, %s426_s27 }
  0x11   :  { %p433_p8 = por %p432_p7, %p431_p6 }
  0x13   :  { %p434_p9 = pnand %p433_p8, %p427_p5 }
  0x15   :  { %437 = shalt.err (!%p434_p9)
}
  0x16   :  { %24 = dma.hbm_to_vmem [thread:$0]  %s554_s0, 256, %s19_s21, [#allocation3], %s486_s23, %s486_s23, %s487_s24  }
  0x17   :  { %s488_s30 = smov [#allocation7]  }
  0x18   :  { %s44_s6 = sshll.u32 %s488_s30, 4  ;;  %s45_s6 = int_to_ptr.vmem [resolvable:$true] %s44_s6 }
  0x19   :  { %s446_s7 = scalar_lea.vmem %s45_s6, 2048  ;;  %p451_p11 = scmp.lt.s32.totalorder %s45_s6, %s45_s6 }
  0x1a   :  { %p447_p10 = scmp.ne.s32.totalorder %s45_s6, %s446_s7  ;;  %p452_p12 = scmp.lt.s32.totalorder %s446_s7, %s446_s7 }
  0x1c   :  { %p453_p13 = por %p452_p12, %p451_p11 }
  0x1e   :  { %p454_p0 = pnand %p453_p13, %p447_p10 }
  0x20   :  { %457 = shalt.err (!%p454_p0)
}
  0x21   :  { %50 = dma.hbm_to_vmem [thread:$0]  %s557_s3, 2048, %s45_s6, [#allocation6], %s486_s23, %s486_s23, %s487_s24  }
  0x22   :  { %478 = dma.done.wait [#allocation3], 256  }
  0x23   :  { %479 = vsyncadd [#allocation3], 4294967040 }
  0x24   :  { %480 = dma.done.wait [#allocation6], 4096  }
  0x25   :  { %481 = vsyncadd [#allocation6], 4294963200  ;;  %v79_v0 = vld [vmem:[#allocation5 + $0x78] sm:$0xff]  ;;  %v78_v1 = vld [vmem:[#allocation5 + $0x70] sm:$0xff]  ;;  %s489_s11 = smov [#allocation8]  }
  0x26   :  { %322 = vmatprep.subr.mxu0 %v79_v0  ;;  %v77_v2 = vld [vmem:[#allocation5 + $0x68] sm:$0xff]  ;;  %v76_v3 = vld [vmem:[#allocation5 + $0x60] sm:$0xff]  ;;  %v538_v4 = vld [vmem:[#allocation2] sm:$0xff]  ;;  %s271_s12 = sshll.u32 %s489_s11, 4  ;;  %s272_s12 = int_to_ptr.vmem [resolvable:$true] %s271_s12 }
  0x27   :  { %323 = vmatpush3.msra.mxu0 %v79_v0  ;;  %v75_v5 = vld [vmem:[#allocation5 + $0x58] sm:$0xff]  ;;  %354 = vmatprep.mubr.f32.mxu0 %v538_v4  ;;  %v178_v7 = vld [vmem:[#allocation7 + $0x70] sm:$0xff]  ;;  %v177_v9 = vld [vmem:[#allocation7 + $0x68] sm:$0xff]  ;;  %p463_p2 = scmp.lt.s32.totalorder %s272_s12, %s272_s12 }
  0x28   :  { %324 = vmatprep.subr.mxu0 %v78_v1  ;;  %v179_v6 = vld [vmem:[#allocation7 + $0x78] sm:$0xff]  ;;  %v74_v8 = vld [vmem:[#allocation5 + $0x50] sm:$0xff]  ;;  %v73_v10 = vld [vmem:[#allocation5 + $0x48] sm:$0xff] }
  0x29   :  { %325 = vmatpush3.msra.mxu0 %v78_v1  ;;  %357 = vmatprep.subr.mxu1 %v179_v6  ;;  %v176_v11 = vld [vmem:[#allocation7 + $0x60] sm:$0xff]  ;;  %v175_v13 = vld [vmem:[#allocation7 + $0x58] sm:$0xff]  ;;  %v174_v15 = vld [vmem:[#allocation7 + $0x50] sm:$0xff] }
  0x2a   :  { %326 = vmatprep.subr.mxu0 %v77_v2  ;;  %358 = vmatpush3.msra.mxu1 %v179_v6  ;;  %v72_v12 = vld [vmem:[#allocation5 + $0x40] sm:$0xff]  ;;  %v71_v14 = vld [vmem:[#allocation5 + $0x38] sm:$0xff]  ;;  %v70_v16 = vld [vmem:[#allocation5 + $0x30] sm:$0xff] }
  0x2b   :  { %327 = vmatpush3.msra.mxu0 %v77_v2  ;;  %359 = vmatprep.subr.mxu1 %v178_v7  ;;  %v173_v17 = vld [vmem:[#allocation7 + $0x48] sm:$0xff]  ;;  %v172_v19 = vld [vmem:[#allocation7 + $0x40] sm:$0xff]  ;;  %v171_v21 = vld [vmem:[#allocation7 + $0x38] sm:$0xff] }
  0x2c   :  { %328 = vmatprep.subr.mxu0 %v76_v3  ;;  %360 = vmatpush3.msra.mxu1 %v178_v7  ;;  %v69_v18 = vld [vmem:[#allocation5 + $0x28] sm:$0xff]  ;;  %v68_v20 = vld [vmem:[#allocation5 + $0x20] sm:$0xff]  ;;  %v67_v22 = vld [vmem:[#allocation5 + $0x18] sm:$0xff] }
  0x2d   :  { %329 = vmatpush3.msra.mxu0 %v76_v3  ;;  %361 = vmatprep.subr.mxu1 %v177_v9  ;;  %v170_v23 = vld [vmem:[#allocation7 + $0x30] sm:$0xff]  ;;  %v169_v25 = vld [vmem:[#allocation7 + $0x28] sm:$0xff]  ;;  %v168_v27 = vld [vmem:[#allocation7 + $0x20] sm:$0xff] }
  0x2e   :  { %330 = vmatprep.subr.mxu0 %v75_v5  ;;  %362 = vmatpush3.msra.mxu1 %v177_v9  ;;  %v66_v24 = vld [vmem:[#allocation5 + $0x10] sm:$0xff]  ;;  %v65_v26 = vld [vmem:[#allocation5 + $0x8] sm:$0xff]  ;;  %v64_v28 = vld [vmem:[#allocation5] sm:$0xff] }
  0x2f   :  { %331 = vmatpush3.msra.mxu0 %v75_v5  ;;  %363 = vmatprep.subr.mxu1 %v176_v11  ;;  %v63_v29 = vld [vmem:[#allocation2 + $0x8] sm:$0xff]  ;;  %v166_v31 = vld [vmem:[#allocation7 + $0x10] sm:$0xff]  ;;  %v165_v32 = vld [vmem:[#allocation7 + $0x8] sm:$0xff] }
  0x30   :  { %332 = vmatprep.subr.mxu0 %v74_v8  ;;  %364 = vmatpush3.msra.mxu1 %v176_v11  ;;  %v167_v30 = vld [vmem:[#allocation7 + $0x18] sm:$0xff]  ;;  %v164_v33 = vld [vmem:[#allocation7] sm:$0xff]  ;;  %v284_v34 = vld [vmem:[%s556_s2] ss:$0 sm:$0xff]  ;;  %s458_s2 = scalar_lea.vmem %s272_s12, 256 }
  0x31   :  { %333 = vmatpush3.msra.mxu0 %v74_v8  ;;  %365 = vmatprep.subr.mxu1 %v175_v13  ;;  %v285_v41 = vld [vmem:[%s558_s4] ss:$0 sm:$0xff]  ;;  %p459_p1 = scmp.ne.s32.totalorder %s272_s12, %s458_s2  ;;  %p464_p3 = scmp.lt.s32.totalorder %s458_s2, %s458_s2 }
  0x32   :  { %334 = vmatprep.subr.mxu0 %v73_v10  ;;  %366 = vmatpush3.msra.mxu1 %v175_v13 }
  0x33   :  { %335 = vmatpush3.msra.mxu0 %v73_v10  ;;  %367 = vmatprep.subr.mxu1 %v174_v15  ;;  %p465_p4 = por %p464_p3, %p463_p2 }
  0x34   :  { %336 = vmatprep.subr.mxu0 %v72_v12  ;;  %368 = vmatpush3.msra.mxu1 %v174_v15 }
  0x35   :  { %337 = vmatpush3.msra.mxu0 %v72_v12  ;;  %369 = vmatprep.subr.mxu1 %v173_v17  ;;  %p466_p5 = pnand %p465_p4, %p459_p1 }
  0x36   :  { %338 = vmatprep.subr.mxu0 %v71_v14  ;;  %370 = vmatpush3.msra.mxu1 %v173_v17 }
  0x37   :  { %339 = vmatpush3.msra.mxu0 %v71_v14  ;;  %371 = vmatprep.subr.mxu1 %v172_v19 }
  0x38   :  { %340 = vmatprep.subr.mxu0 %v70_v16  ;;  %372 = vmatpush3.msra.mxu1 %v172_v19 }
  0x39   :  { %341 = vmatpush3.msra.mxu0 %v70_v16  ;;  %373 = vmatprep.subr.mxu1 %v171_v21 }
  0x3a   :  { %342 = vmatprep.subr.mxu0 %v69_v18  ;;  %374 = vmatpush3.msra.mxu1 %v171_v21 }
  0x3b   :  { %343 = vmatpush3.msra.mxu0 %v69_v18  ;;  %375 = vmatprep.subr.mxu1 %v170_v23 }
  0x3c   :  { %344 = vmatprep.subr.mxu0 %v68_v20  ;;  %376 = vmatpush3.msra.mxu1 %v170_v23 }
  0x3d   :  { %345 = vmatpush3.msra.mxu0 %v68_v20  ;;  %377 = vmatprep.subr.mxu1 %v169_v25 }
  0x3e   :  { %346 = vmatprep.subr.mxu0 %v67_v22  ;;  %378 = vmatpush3.msra.mxu1 %v169_v25 }
  0x3f   :  { %347 = vmatpush3.msra.mxu0 %v67_v22  ;;  %379 = vmatprep.subr.mxu1 %v168_v27 }
  0x40   :  { %348 = vmatprep.subr.mxu0 %v66_v24  ;;  %380 = vmatpush3.msra.mxu1 %v168_v27 }
  0x41   :  { %349 = vmatpush3.msra.mxu0 %v66_v24  ;;  %381 = vmatprep.subr.mxu1 %v167_v30 }
  0x42   :  { %350 = vmatprep.subr.mxu0 %v65_v26  ;;  %382 = vmatpush3.msra.mxu1 %v167_v30 }
  0x43   :  { %351 = vmatpush3.msra.mxu0 %v65_v26  ;;  %383 = vmatprep.subr.mxu1 %v166_v31 }
  0x44   :  { %352 = vmatprep.subr.mxu0 %v64_v28  ;;  %384 = vmatpush3.msra.mxu1 %v166_v31 }
  0x45   :  { %353 = vmatpush3.msra.mxu0 %v64_v28  ;;  %385 = vmatprep.subr.mxu1 %v165_v32 }
  0x46   :  { %355 = vmatmul.mubr.f32.vlgmr.msra.gmra.mxu0 %v63_v29  ;;  %386 = vmatpush3.msra.mxu1 %v165_v32 }
  0x47   :  { %387 = vmatprep.subr.mxu1 %v164_v33 }
  0x48   :  { %388 = vmatpush3.msra.mxu1 %v164_v33 }
 0x106   :  { %v356_v35 = vpop.f32.mrf.mxu0 }
 0x107   :  { %v159_v36 = vadd.f32 %v356_v35, %v284_v34 }
 0x108   :  { %v153_v37 = vpop.f32.mrf.mxu0 }
 0x109   :  { %v154_v38 = vadd.f32 %v284_v34, %v153_v37  ;;  %v163_v40 = vmax.f32 %v159_v36, 0.0 }
 0x10b   :  { %v162_v39 = vmax.f32 %v154_v38, 0.0 }
 0x10d   :  { %389 = vmatprep.mubr.f32.mxu1 %v162_v39 }
 0x10e   :  { %390 = vmatmul.mubr.f32.vlgmr.msra.gmra.mxu1 %v163_v40 }
 0x1ce   :  { %v391_v42 = vpop.f32.mrf.mxu1 }
 0x1cf   :  { %v259_v43 = vadd.f32 %v391_v42, %v285_v41 }
 0x1d0   :  { %v253_v44 = vpop.f32.mrf.mxu1 }
 0x1d1   :  { %v263_v45 = vadd.f32 %v259_v43, %v63_v29  ;;  %v254_v46 = vadd.f32 %v285_v41, %v253_v44 }
 0x1d3   :  { %265 = vst [vmem:[#allocation8 + $0x8] sm:$0xff] %v263_v45  ;;  %v262_v47 = vadd.f32 %v254_v46, %v538_v4 }
 0x1d5   :  { %264 = vst [vmem:[#allocation8] sm:$0xff] %v262_v47 }
 0x1d6   :  { %469 = shalt.err (!%p466_p5)
}
 0x1d7   :  { %277 = dma.vmem_to_hbm [thread:$0]  %s272_s12, 256, %s559_s5, [#allocation4], %s486_s23, %s486_s23, %s487_s24  }
 0x1d8   :  { %482 = dma.done.wait [#allocation4], 256  }
 0x1d9   :  { %483 = vsyncadd [#allocation4], 4294967040 }
 0x1da   :  { %281 = vsyncpa [#allocation3], 1 }
 0x1db   :  { %282 = vsyncpa [#allocation6], 1 }
 0x1dc   :  { %283 = vsyncpa [#allocation4], 1 }

</bundles_post_ra>
